<compile_context>
chip_gen: v7x
topology: tpu7x:2x2x1
jax: 0.10.0
libtpu: 0.0.40
codegen_flags: <defaults>
</compile_context>

<pallas_src>
import jax
import jax.numpy as jnp
from jax.experimental import pallas as pl
from jax.experimental.pallas import tpu as pltpu  # noqa: F401  (TPU-specific tuning hooks)

# Logical model sizes (from the PyTorch module)
INPUT_SIZE = 100
HIDDEN_SIZE = 1000
OUTPUT_SIZE = 10

# Hardware-padded sizes (multiples of the 128-lane vreg width); output stays compact.
IN_PAD = 128
HID_PAD = 1024


def _round_up(n, m):
    return ((n + m - 1) // m) * m


def mlp_kernel(x_ref, w1_ref, b1_ref, w2_ref, b2_ref, o_ref):
    # linear1 on MXU: (B_pad, 128)bf16 @ (128, 1024)bf16 -> f32 accum
    h = jnp.dot(x_ref[...], w1_ref[...], preferred_element_type=jnp.float32)
    h = jnp.maximum(h + b1_ref[...], 0.0)  # bias + ReLU in f32
    # linear2: keep h in f32 (avoids a second bf16 rounding); casting the tiny
    # (1024, 10) w2 tile to f32 in-kernel is negligible, and HBM still only
    # carries the bf16 copy.
    y = jnp.dot(h, w2_ref[...].astype(jnp.float32),
                preferred_element_type=jnp.float32)
    o_ref[...] = (y + b2_ref[...]).astype(o_ref.dtype)


def prepare_params(w1, b1, w2, b2):
    """One-time weight prep (call at model init, NOT per forward).

    Weights are stored pre-transposed relative to nn.Linear (x @ W layout).
    Pads the lane/sublane dims with zeros so padded regions contribute nothing,
    and casts weights to bf16 (f32 accumulation happens in the kernel).
    """
    b1 = jnp.reshape(b1, (1, -1))
    b2 = jnp.reshape(b2, (1, -1))
    w1_p = jnp.zeros((IN_PAD, HID_PAD), jnp.bfloat16).at[
        :INPUT_SIZE, :HIDDEN_SIZE].set(w1.astype(jnp.bfloat16))
    b1_p = jnp.zeros((1, HID_PAD), jnp.float32).at[
        :, :HIDDEN_SIZE].set(b1.astype(jnp.float32))
    # Compact output dim: only the contraction dim (1000 -> 1024) is padded.
    w2_p = jnp.zeros((HID_PAD, OUTPUT_SIZE), jnp.bfloat16).at[
        :HIDDEN_SIZE, :].set(w2.astype(jnp.bfloat16))
    b2_p = b2.astype(jnp.float32)  # (1, 10), compact
    return w1_p, b1_p, w2_p, b2_p


@jax.jit
def mlp_forward(x, w1_p, b1_p, w2_p, b2_p):
    """x: (B, 100) f32; padded params from prepare_params(). Returns (B, 10) f32."""
    B = x.shape[0]
    B_pad = max(16, _round_up(B, 16))  # bf16 vreg is (16, 128) -> fill the sublanes

    # The only per-call padding left in the hot path (~4 KiB), fused by jit.
    x_p = jnp.zeros((B_pad, IN_PAD), jnp.bfloat16).at[:B, :INPUT_SIZE].set(
        x.astype(jnp.bfloat16))

    full = lambda shape: pl.BlockSpec(shape, lambda: (0,) * len(shape))

    flops = 2 * B_pad * (IN_PAD * HID_PAD + HID_PAD * OUTPUT_SIZE)
    bytes_accessed = (x_p.size * 2 + w1_p.size * 2 + b1_p.size * 4
                      + w2_p.size * 2 + b2_p.size * 4 + B_pad * OUTPUT_SIZE * 4)

    out_padded = pl.pallas_call(
        mlp_kernel,
        out_shape=jax.ShapeDtypeStruct((B_pad, OUTPUT_SIZE), jnp.float32),
        grid=(),  # whole problem (~0.3 MiB) fits trivially in VMEM on all generations
        in_specs=[
            full(x_p.shape),
            full(w1_p.shape),
            full(b1_p.shape),
            full(w2_p.shape),
            full(b2_p.shape),
        ],
        out_specs=full((B_pad, OUTPUT_SIZE)),
        cost_estimate=pl.CostEstimate(
            flops=flops, transcendentals=0, bytes_accessed=bytes_accessed),
    )(x_p, w1_p, b1_p, w2_p, b2_p)

    # Padded batch rows hold bias-only values; slice them off. Columns are compact.
    return out_padded[:B, :]


if __name__ == "__main__":
    batch = 8

    key = jax.random.PRNGKey(0)
    kx, k1, k2, k3, k4 = jax.random.split(key, 5)

    # Deterministic parameter init (PyTorch-style uniform(-1/sqrt(fan_in), 1/sqrt(fan_in)))
    bound1 = 1.0 / (INPUT_SIZE ** 0.5)
    bound2 = 1.0 / (HIDDEN_SIZE ** 0.5)
    w1 = jax.random.uniform(k1, (INPUT_SIZE, HIDDEN_SIZE), jnp.float32, -bound1, bound1)
    b1 = jax.random.uniform(k2, (1, HIDDEN_SIZE), jnp.float32, -bound1, bound1)
    w2 = jax.random.uniform(k3, (HIDDEN_SIZE, OUTPUT_SIZE), jnp.float32, -bound2, bound2)
    b2 = jax.random.uniform(k4, (1, OUTPUT_SIZE), jnp.float32, -bound2, bound2)

    x = jax.random.normal(kx, (batch, INPUT_SIZE), jnp.float32)

    # One-time weight prep (init-time cost, off the hot path).
    params = jax.block_until_ready(prepare_params(w1, b1, w2, b2))

    out = mlp_forward(x, *params)
    out = jax.block_until_ready(out)

    # Reference in plain JAX (full f32). Kernel uses bf16 x/weights with f32
    # accumulation, so tolerance is relaxed accordingly.
    ref = jnp.maximum(x @ w1 + b1, 0.0) @ w2 + b2
    assert out.shape == (batch, OUTPUT_SIZE)
    assert jnp.allclose(out, ref, atol=2e-2, rtol=2e-2), (
        f"max abs diff {jnp.max(jnp.abs(out - ref))}")

    print("KERNEL_OK")
</pallas_src>

<mosaic_0001>
module attributes {stable_mosaic.version = 11 : i64} {
  func.func @mlp_kernel(%arg0: memref<16x128xbf16, #tpu.memory_space<vmem>>, %arg1: memref<128x1024xbf16, #tpu.memory_space<vmem>>, %arg2: memref<1x1024xf32, #tpu.memory_space<vmem>>, %arg3: memref<1024x10xbf16, #tpu.memory_space<vmem>>, %arg4: memref<1x10xf32, #tpu.memory_space<vmem>>, %arg5: memref<16x10xf32, #tpu.memory_space<vmem>>) attributes {dimension_semantics = [], scalar_prefetch = 0 : i64, scratch_operands = 0 : i64, tpu.core_type = #tpu.core_type<tc>} {
    %c0 = arith.constant 0 : index
    %c0_0 = arith.constant 0 : index
    %0 = vector.load %arg0[%c0, %c0_0] : memref<16x128xbf16, #tpu.memory_space<vmem>>, vector<16x128xbf16>
    %c0_1 = arith.constant 0 : index
    %c0_2 = arith.constant 0 : index
    %1 = vector.load %arg1[%c0_1, %c0_2] : memref<128x1024xbf16, #tpu.memory_space<vmem>>, vector<128x1024xbf16>
    %cst = arith.constant dense<0.000000e+00> : vector<16x1024xf32>
    %2 = tpu.matmul %0, %1, %cst {dimension_numbers = #tpu.dot_dimension_numbers<[1], [0], [0], [1], [0, 0, 1, 1], [], []>} : vector<16x128xbf16>, vector<128x1024xbf16>, vector<16x1024xf32> -> vector<16x1024xf32>
    %c0_3 = arith.constant 0 : index
    %c0_4 = arith.constant 0 : index
    %3 = vector.load %arg2[%c0_3, %c0_4] : memref<1x1024xf32, #tpu.memory_space<vmem>>, vector<1x1024xf32>
    %4 = vector.broadcast %3 : vector<1x1024xf32> to vector<16x1024xf32>
    %5 = arith.addf %2, %4 : vector<16x1024xf32>
    %cst_5 = arith.constant 0.000000e+00 : f32
    %6 = vector.broadcast %cst_5 : f32 to vector<16x1024xf32>
    %7 = arith.maximumf %5, %6 : vector<16x1024xf32>
    %c0_6 = arith.constant 0 : index
    %c0_7 = arith.constant 0 : index
    %8 = vector.load %arg3[%c0_6, %c0_7] : memref<1024x10xbf16, #tpu.memory_space<vmem>>, vector<1024x10xbf16>
    %9 = arith.extf %8 : vector<1024x10xbf16> to vector<1024x10xf32>
    %cst_8 = arith.constant dense<0.000000e+00> : vector<16x10xf32>
    %10 = tpu.matmul %7, %9, %cst_8 {dimension_numbers = #tpu.dot_dimension_numbers<[1], [0], [0], [1], [0, 0, 1, 1], [], []>} : vector<16x1024xf32>, vector<1024x10xf32>, vector<16x10xf32> -> vector<16x10xf32>
    %c0_9 = arith.constant 0 : index
    %c0_10 = arith.constant 0 : index
    %11 = vector.load %arg4[%c0_9, %c0_10] : memref<1x10xf32, #tpu.memory_space<vmem>>, vector<1x10xf32>
    %12 = vector.broadcast %11 : vector<1x10xf32> to vector<16x10xf32>
    %13 = arith.addf %10, %12 : vector<16x10xf32>
    %c0_11 = arith.constant 0 : index
    %c0_12 = arith.constant 0 : index
    %14 = vector.load %arg5[%c0_11, %c0_12] : memref<16x10xf32, #tpu.memory_space<vmem>>, vector<16x10xf32>
    tpu.vector_store %arg5[%c0_11, %c0_12], %13 {strides = array<i32>} : memref<16x10xf32, #tpu.memory_space<vmem>>, vector<16x10xf32>,
    return
  }
}

</mosaic_0001>

<bundles_post_ra>
// kernel: mlp_forward.1
= control target key start
LH: loop header
LB: loop body
LE: loop exit
PB: predicated region body
PF: predicated region fallthrough
CT: control target
= control target key end

     0   :  { %v1880_v3 = vmov 0   ;;  %vm1206_vm0 = vcmask 80896   ;;  %s2340_s1 = inlined_call_operand.vmem [shape: bf16[128,1024], index: 1, kind: input, shape index: {}]   ;;  %s2341_s0 = inlined_call_operand.vmem [shape: bf16[16,128], index: 0, kind: input, shape index: {}]   ;;  %s2342_s3 = inlined_call_operand.vmem [shape: bf16[1024,10], index: 3, kind: input, shape index: {}]   ;;  %s2343_s2 = inlined_call_operand.vmem [shape: f32[1,1024], index: 2, kind: input, shape index: {}]   ;;  %s2344_s4 = inlined_call_operand.vmem [shape: f32[1,10], index: 4, kind: input, shape index: {}]   ;;  %s2345_s5 = inlined_call_operand.vmem [shape: f32[16,10], index: 5, kind: output, shape index: {}]  }
   0x1   :  { %v23_v0 = vld [vmem:[%s2340_s1] sm:$0xff]  ;;  %v24_v2 = vld [vmem:[%s2340_s1 + $0x8] sm:$0xff]  ;;  %487 = vmatprep.mubr.bf16.mxu0 %v1880_v3  ;;  %530 = vmatprep.mubr.bf16.mxu1 %v1880_v3  ;;  %v25_v63 = vld [vmem:[%s2340_s1 + $0x10] sm:$0xff] }
   0x2   :  { %v27_v1 = vld [vmem:[%s2340_s1 + $0x20] sm:$0xff]  ;;  %v28_v5 = vld [vmem:[%s2340_s1 + $0x28] sm:$0xff] }
   0x3   :  { %v1215_v4 = vcombine.high %v23_v0, %v27_v1  ;;  %v1214_v6 = vcombine.low %v23_v0, %v27_v1  ;;  %v31_v7 = vld [vmem:[%s2340_s1 + $0x40] sm:$0xff]  ;;  %v1217_v9 = vcombine.high %v24_v2, %v28_v5  ;;  %v1216_v10 = vcombine.low %v24_v2, %v28_v5  ;;  %v32_v12 = vld [vmem:[%s2340_s1 + $0x48] sm:$0xff]  ;;  %v29_v0 = vld [vmem:[%s2340_s1 + $0x30] sm:$0xff] }
   0x4   :  { %v35_v8 = vld [vmem:[%s2340_s1 + $0x60] sm:$0xff]  ;;  %v36_v13 = vld [vmem:[%s2340_s1 + $0x68] sm:$0xff]  ;;  %v26_v1 = vld [vmem:[%s2340_s1 + $0x18] sm:$0xff] }
   0x5   :  { %v1223_v11 = vcombine.high %v31_v7, %v35_v8  ;;  %v39_v14 = vld [vmem:[%s2340_s1 + $0x80] sm:$0xff]  ;;  %455 = vmatprep.subr.bf16.mxu0 %v1215_v4  ;;  %v1225_v15 = vcombine.high %v32_v12, %v36_v13  ;;  %v40_v17 = vld [vmem:[%s2340_s1 + $0x88] sm:$0xff]  ;;  %498 = vmatprep.subr.bf16.mxu1 %v1217_v9  ;;  %v1222_v19 = vcombine.low %v31_v7, %v35_v8  ;;  %v30_v2 = vld [vmem:[%s2340_s1 + $0x38] sm:$0xff] }
   0x6   :  { %v43_v16 = vld [vmem:[%s2340_s1 + $0xa0] sm:$0xff]  ;;  %v44_v18 = vld [vmem:[%s2340_s1 + $0xa8] sm:$0xff]  ;;  %456 = vmatpush1.bf16.msra.mxu0 %v1214_v6  ;;  %499 = vmatpush1.bf16.msra.mxu1 %v1216_v10  ;;  %v1224_v20 = vcombine.low %v32_v12, %v36_v13  ;;  %v1219_v6 = vcombine.high %v25_v63, %v29_v0  ;;  %v1221_v7 = vcombine.high %v26_v1, %v30_v2  ;;  %v33_v8 = vld [vmem:[%s2340_s1 + $0x50] sm:$0xff] }
   0x7   :  { %457 = vmatprep.subr.bf16.mxu0 %v1223_v11  ;;  %v1231_v21 = vcombine.high %v39_v14, %v43_v16  ;;  %500 = vmatprep.subr.bf16.mxu1 %v1225_v15  ;;  %v1233_v22 = vcombine.high %v40_v17, %v44_v18  ;;  %v47_v23 = vld [vmem:[%s2340_s1 + $0xc0] sm:$0xff]  ;;  %v48_v25 = vld [vmem:[%s2340_s1 + $0xc8] sm:$0xff]  ;;  %v1230_v27 = vcombine.low %v39_v14, %v43_v16  ;;  %v37_v9 = vld [vmem:[%s2340_s1 + $0x70] sm:$0xff] }
   0x8   :  { %v51_v24 = vld [vmem:[%s2340_s1 + $0xe0] sm:$0xff]  ;;  %v52_v26 = vld [vmem:[%s2340_s1 + $0xe8] sm:$0xff]  ;;  %v1232_v28 = vcombine.low %v40_v17, %v44_v18  ;;  %v34_v11 = vld [vmem:[%s2340_s1 + $0x58] sm:$0xff]  ;;  %v1218_v13 = vcombine.low %v25_v63, %v29_v0  ;;  %v1220_v14 = vcombine.low %v26_v1, %v30_v2  ;;  %v1227_v15 = vcombine.high %v33_v8, %v37_v9 }
   0x9   :  { %v1239_v29 = vcombine.high %v47_v23, %v51_v24  ;;  %v1241_v30 = vcombine.high %v48_v25, %v52_v26  ;;  %v55_v31 = vld [vmem:[%s2340_s1 + $0x100] sm:$0xff]  ;;  %v56_v33 = vld [vmem:[%s2340_s1 + $0x108] sm:$0xff]  ;;  %v1238_v35 = vcombine.low %v47_v23, %v51_v24  ;;  %v1240_v36 = vcombine.low %v48_v25, %v52_v26  ;;  %v38_v12 = vld [vmem:[%s2340_s1 + $0x78] sm:$0xff] }
   0xa   :  { %458 = vmatpush1.bf16.msra.mxu0 %v1222_v19  ;;  %501 = vmatpush1.bf16.msra.mxu1 %v1224_v20  ;;  %v59_v32 = vld [vmem:[%s2340_s1 + $0x120] sm:$0xff]  ;;  %v60_v34 = vld [vmem:[%s2340_s1 + $0x128] sm:$0xff]  ;;  %v1229_v16 = vcombine.high %v34_v11, %v38_v12  ;;  %v41_v17 = vld [vmem:[%s2340_s1 + $0x90] sm:$0xff] }
   0xb   :  { %459 = vmatprep.subr.bf16.mxu0 %v1231_v21  ;;  %502 = vmatprep.subr.bf16.mxu1 %v1233_v22  ;;  %v1247_v37 = vcombine.high %v55_v31, %v59_v32  ;;  %v1249_v38 = vcombine.high %v56_v33, %v60_v34  ;;  %v63_v39 = vld [vmem:[%s2340_s1 + $0x140] sm:$0xff]  ;;  %v64_v41 = vld [vmem:[%s2340_s1 + $0x148] sm:$0xff]  ;;  %v1246_v43 = vcombine.low %v55_v31, %v59_v32  ;;  %v45_v18 = vld [vmem:[%s2340_s1 + $0xb0] sm:$0xff] }
   0xc   :  { %v67_v40 = vld [vmem:[%s2340_s1 + $0x160] sm:$0xff]  ;;  %v68_v42 = vld [vmem:[%s2340_s1 + $0x168] sm:$0xff]  ;;  %v1248_v44 = vcombine.low %v56_v33, %v60_v34  ;;  %v42_v19 = vld [vmem:[%s2340_s1 + $0x98] sm:$0xff]  ;;  %v1226_v21 = vcombine.low %v33_v8, %v37_v9  ;;  %v1228_v22 = vcombine.low %v34_v11, %v38_v12  ;;  %v1235_v23 = vcombine.high %v41_v17, %v45_v18 }
   0xd   :  { %v1255_v45 = vcombine.high %v63_v39, %v67_v40  ;;  %v1257_v46 = vcombine.high %v64_v41, %v68_v42  ;;  %v71_v47 = vld [vmem:[%s2340_s1 + $0x180] sm:$0xff]  ;;  %v72_v49 = vld [vmem:[%s2340_s1 + $0x188] sm:$0xff]  ;;  %v1254_v51 = vcombine.low %v63_v39, %v67_v40  ;;  %v1256_v52 = vcombine.low %v64_v41, %v68_v42  ;;  %v46_v20 = vld [vmem:[%s2340_s1 + $0xb8] sm:$0xff] }
   0xe   :  { %460 = vmatpush1.bf16.msra.mxu0 %v1230_v27  ;;  %503 = vmatpush1.bf16.msra.mxu1 %v1232_v28  ;;  %v75_v48 = vld [vmem:[%s2340_s1 + $0x1a0] sm:$0xff]  ;;  %v76_v50 = vld [vmem:[%s2340_s1 + $0x1a8] sm:$0xff]  ;;  %v1237_v24 = vcombine.high %v42_v19, %v46_v20  ;;  %v49_v25 = vld [vmem:[%s2340_s1 + $0xd0] sm:$0xff] }
   0xf   :  { %461 = vmatprep.subr.bf16.mxu0 %v1239_v29  ;;  %504 = vmatprep.subr.bf16.mxu1 %v1241_v30  ;;  %v1263_v53 = vcombine.high %v71_v47, %v75_v48  ;;  %v1265_v54 = vcombine.high %v72_v49, %v76_v50  ;;  %v79_v55 = vld [vmem:[%s2340_s1 + $0x1c0] sm:$0xff]  ;;  %v80_v57 = vld [vmem:[%s2340_s1 + $0x1c8] sm:$0xff]  ;;  %v1262_v59 = vcombine.low %v71_v47, %v75_v48  ;;  %v53_v26 = vld [vmem:[%s2340_s1 + $0xf0] sm:$0xff] }
  0x10   :  { %v83_v56 = vld [vmem:[%s2340_s1 + $0x1e0] sm:$0xff]  ;;  %v84_v58 = vld [vmem:[%s2340_s1 + $0x1e8] sm:$0xff]  ;;  %v1264_v60 = vcombine.low %v72_v49, %v76_v50  ;;  %v50_v27 = vld [vmem:[%s2340_s1 + $0xd8] sm:$0xff]  ;;  %v1234_v29 = vcombine.low %v41_v17, %v45_v18  ;;  %v1236_v30 = vcombine.low %v42_v19, %v46_v20  ;;  %v1243_v31 = vcombine.high %v49_v25, %v53_v26 }
  0x11   :  { %v1271_v61 = vcombine.high %v79_v55, %v83_v56  ;;  %v1273_v62 = vcombine.high %v80_v57, %v84_v58  ;;  %v1270_v4 = vcombine.low %v79_v55, %v83_v56  ;;  %v1272_v5 = vcombine.low %v80_v57, %v84_v58  ;;  %v2030_v10 = vld [vmem:[%s2341_s0] sm:$0xff]   ;;  %v54_v28 = vld [vmem:[%s2340_s1 + $0xf8] sm:$0xff]  ;;  %v57_v33 = vld [vmem:[%s2340_s1 + $0x110] sm:$0xff] }
  0x12   :  { %462 = vmatpush1.bf16.msra.mxu0 %v1238_v35  ;;  %505 = vmatpush1.bf16.msra.mxu1 %v1240_v36  ;;  %v1245_v32 = vcombine.high %v50_v27, %v54_v28  ;;  %v61_v34 = vld [vmem:[%s2340_s1 + $0x130] sm:$0xff]  ;;  %v62_v35 = vld [vmem:[%s2340_s1 + $0x138] sm:$0xff]  ;;  %v1242_v36 = vcombine.low %v49_v25, %v53_v26  ;;  %v1542_v2 = vld [vmem:[%s2342_s3 + $0x40] sm:$0xff]  }
  0x13   :  { %463 = vmatprep.subr.bf16.mxu0 %v1247_v37  ;;  %506 = vmatprep.subr.bf16.mxu1 %v1249_v38  ;;  %v1244_v37 = vcombine.low %v50_v27, %v54_v28  ;;  %v1251_v38 = vcombine.high %v57_v33, %v61_v34  ;;  %v65_v40 = vld [vmem:[%s2340_s1 + $0x150] sm:$0xff]  ;;  %v66_v42 = vld [vmem:[%s2340_s1 + $0x158] sm:$0xff]  ;;  %v1559_v8 = vld [vmem:[%s2342_s3 + $0xc8] sm:$0xff]  }
  0x14   :  { %v69_v41 = vld [vmem:[%s2340_s1 + $0x170] sm:$0xff]  ;;  %v74_v50 = vld [vmem:[%s2340_s1 + $0x198] sm:$0xff]  ;;  %v1535_v9 = vld [vmem:[%s2342_s3 + $0x8] sm:$0xff]  }
  0x15   :  { %v73_v48 = vld [vmem:[%s2340_s1 + $0x190] sm:$0xff]  ;;  %v82_v58 = vld [vmem:[%s2340_s1 + $0x1d8] sm:$0xff]  ;;  %v1551_v11 = vld [vmem:[%s2342_s3 + $0x88] sm:$0xff]  }
  0x16   :  { %464 = vmatpush1.bf16.msra.mxu0 %v1246_v43  ;;  %507 = vmatpush1.bf16.msra.mxu1 %v1248_v44  ;;  %v70_v43 = vld [vmem:[%s2340_s1 + $0x178] sm:$0xff]  ;;  %v1250_v44 = vcombine.low %v57_v33, %v61_v34  ;;  %v77_v49 = vld [vmem:[%s2340_s1 + $0x1b0] sm:$0xff]  ;;  %v1546_v19 = vld [vmem:[%s2342_s3 + $0x60] sm:$0xff]  }
  0x17   :  { %465 = vmatprep.subr.bf16.mxu0 %v1255_v45  ;;  %508 = vmatprep.subr.bf16.mxu1 %v1257_v46  ;;  %v1259_v46 = vcombine.high %v65_v40, %v69_v41  ;;  %v1261_v47 = vcombine.high %v66_v42, %v70_v43  ;;  %v81_v56 = vld [vmem:[%s2340_s1 + $0x1d0] sm:$0xff]  ;;  %v1537_v17 = vld [vmem:[%s2342_s3 + $0x18] sm:$0xff]   ;;  %v1562_v20 = vld [vmem:[%s2342_s3 + $0xe0] sm:$0xff]  }
  0x18   :  { %v85_v57 = vld [vmem:[%s2340_s1 + $0x1f0] sm:$0xff]  ;;  %v1553_v18 = vld [vmem:[%s2342_s3 + $0x98] sm:$0xff]   ;;  %v1539_v25 = vld [vmem:[%s2342_s3 + $0x28] sm:$0xff]  }
  0x19   :  { %v1274_v0 = vcombine.low %v81_v56, %v85_v57  ;;  %v1544_v12 = vld [vmem:[%s2342_s3 + $0x50] sm:$0xff]   ;;  %v1555_v26 = vld [vmem:[%s2342_s3 + $0xa8] sm:$0xff]   ;;  %v1541_v33 = vld [vmem:[%s2342_s3 + $0x38] sm:$0xff]  }
  0x1a   :  { %466 = vmatpush1.bf16.msra.mxu0 %v1254_v51  ;;  %509 = vmatpush1.bf16.msra.mxu1 %v1256_v52  ;;  %v78_v51 = vld [vmem:[%s2340_s1 + $0x1b8] sm:$0xff]  ;;  %v1258_v52 = vcombine.low %v65_v40, %v69_v41  ;;  %v1548_v27 = vld [vmem:[%s2342_s3 + $0x70] sm:$0xff]  }
  0x1b   :  { %467 = vmatprep.subr.bf16.mxu0 %v1263_v53  ;;  %510 = vmatprep.subr.bf16.mxu1 %v1265_v54  ;;  %v1260_v53 = vcombine.low %v66_v42, %v70_v43  ;;  %v1267_v54 = vcombine.high %v73_v48, %v77_v49  ;;  %v1269_v55 = vcombine.high %v74_v50, %v78_v51  ;;  %v1564_v28 = vld [vmem:[%s2342_s3 + $0xf0] sm:$0xff]   ;;  %v1557_v34 = vld [vmem:[%s2342_s3 + $0xb8] sm:$0xff]  }
  0x1e   :  { %468 = vmatpush1.bf16.msra.mxu0 %v1262_v59  ;;  %511 = vmatpush1.bf16.msra.mxu1 %v1264_v60  ;;  %v86_v59 = vld [vmem:[%s2340_s1 + $0x1f8] sm:$0xff]  ;;  %v1266_v60 = vcombine.low %v73_v48, %v77_v49 }
  0x1f   :  { %469 = vmatprep.subr.bf16.mxu0 %v1271_v61  ;;  %512 = vmatprep.subr.bf16.mxu1 %v1273_v62  ;;  %v1268_v61 = vcombine.low %v74_v50, %v78_v51  ;;  %v1275_v62 = vcombine.high %v81_v56, %v85_v57  ;;  %v1277_v63 = vcombine.high %v82_v58, %v86_v59 }
  0x20   :  { %v1276_v1 = vcombine.low %v82_v58, %v86_v59 }
  0x22   :  { %470 = vmatpush1.bf16.msra.mxu0 %v1270_v4  ;;  %513 = vmatpush1.bf16.msra.mxu1 %v1272_v5  ;;  %v1558_v4 = vld [vmem:[%s2342_s3 + $0xc0] sm:$0xff]  }
  0x23   :  { %541 = vmatprep.subr.bf16.mxu0 %v1219_v6  ;;  %584 = vmatprep.subr.bf16.mxu1 %v1221_v7  ;;  %v1280_v5 = vld [vmem:[%s2342_s3] sm:$0xff]   ;;  %v1543_v7 = vld [vmem:[%s2342_s3 + $0x48] sm:$0xff]  }
  0x24   :  { %v1550_v6 = vld [vmem:[%s2342_s3 + $0x80] sm:$0xff]  }
  0x25   :  { %488 = vmatmul.mubr.bf16.vlgmr.msra.gmra.mrb[0].mxu0 %v2030_v10  ;;  %531 = vmatmul.mubr.bf16.vlgmr.msra.gmra.mrb[0].mxu1 %v2030_v10 }
  0x26   :  { %542 = vmatpush1.bf16.msra.mxu0 %v1218_v13  ;;  %585 = vmatpush1.bf16.msra.mxu1 %v1220_v14  ;;  %v1536_v13 = vld [vmem:[%s2342_s3 + $0x10] sm:$0xff]  }
  0x27   :  { %543 = vmatprep.subr.bf16.mxu0 %v1227_v15  ;;  %586 = vmatprep.subr.bf16.mxu1 %v1229_v16  ;;  %v1552_v14 = vld [vmem:[%s2342_s3 + $0x90] sm:$0xff]   ;;  %v1545_v15 = vld [vmem:[%s2342_s3 + $0x58] sm:$0xff]  }
  0x28   :  { %573 = vmatprep.mubr.bf16.mxu0 %v1880_v3  ;;  %616 = vmatprep.mubr.bf16.mxu1 %v1880_v3  ;;  %v58_v3 = vld [vmem:[%s2340_s1 + $0x118] sm:$0xff] }
  0x29   :  { %v1253_v39 = vcombine.high %v58_v3, %v62_v35  ;;  %v1252_v45 = vcombine.low %v58_v3, %v62_v35  ;;  %v1561_v16 = vld [vmem:[%s2342_s3 + $0xd8] sm:$0xff]   ;;  %v1574_v3 = vld [vmem:[%s2342_s3 + $0x140] sm:$0xff]  }
  0x2a   :  { %544 = vmatpush1.bf16.msra.mxu0 %v1226_v21  ;;  %587 = vmatpush1.bf16.msra.mxu1 %v1228_v22  ;;  %v1538_v21 = vld [vmem:[%s2342_s3 + $0x20] sm:$0xff]  }
  0x2b   :  { %545 = vmatprep.subr.bf16.mxu0 %v1235_v23  ;;  %588 = vmatprep.subr.bf16.mxu1 %v1237_v24  ;;  %v1554_v22 = vld [vmem:[%s2342_s3 + $0xa0] sm:$0xff]   ;;  %v1547_v23 = vld [vmem:[%s2342_s3 + $0x68] sm:$0xff]  }
  0x2c   :  { %v1563_v24 = vld [vmem:[%s2342_s3 + $0xe8] sm:$0xff]   ;;  %v1590_v35 = vld [vmem:[%s2342_s3 + $0x1c0] sm:$0xff]  }
  0x2e   :  { %546 = vmatpush1.bf16.msra.mxu0 %v1234_v29  ;;  %589 = vmatpush1.bf16.msra.mxu1 %v1236_v30  ;;  %v1540_v29 = vld [vmem:[%s2342_s3 + $0x30] sm:$0xff]  }
  0x2f   :  { %547 = vmatprep.subr.bf16.mxu0 %v1243_v31  ;;  %590 = vmatprep.subr.bf16.mxu1 %v1245_v32  ;;  %v1556_v30 = vld [vmem:[%s2342_s3 + $0xb0] sm:$0xff]   ;;  %v1549_v31 = vld [vmem:[%s2342_s3 + $0x78] sm:$0xff]  }
  0x30   :  { %v1565_v32 = vld [vmem:[%s2342_s3 + $0xf8] sm:$0xff]  }
  0x32   :  { %548 = vmatpush1.bf16.msra.mxu0 %v1242_v36  ;;  %591 = vmatpush1.bf16.msra.mxu1 %v1244_v37  ;;  %v89_v36 = vlaneseq }
  0x33   :  { %549 = vmatprep.subr.bf16.mxu0 %v1251_v38  ;;  %592 = vmatprep.subr.bf16.mxu1 %v1253_v39  ;;  %v2224_v39 = vld [vmem:[%s2343_s2] sm:$0xff] }
  0x34   :  { %v2218_v37 = vshrl.u32 %v89_v36, 7 }
  0x36   :  { %550 = vmatpush1.bf16.msra.mxu0 %v1250_v44  ;;  %593 = vmatpush1.bf16.msra.mxu1 %v1252_v45  ;;  %v91_v38 = vsub.s32 0, %v2218_v37  ;;  %v99_v40 = vsub.s32 2, %v2218_v37  ;;  %v95_v41 = vsub.s32 1, %v2218_v37  ;;  %v103_v42 = vsub.s32 3, %v2218_v37 }
  0x37   :  { %551 = vmatprep.subr.bf16.mxu0 %v1259_v46  ;;  %594 = vmatprep.subr.bf16.mxu1 %v1261_v47 }
  0x38   :  { %v92_v43 = vrot.slane %v2224_v39, %v91_v38  ;;  %v100_v44 = vrot.slane %v2224_v39, %v99_v40  ;;  %v96_v45 = vrot.slane %v2224_v39, %v95_v41  ;;  %v104_v46 = vrot.slane %v2224_v39, %v103_v42  ;;  %v1572_v38 = vld [vmem:[%s2342_s3 + $0x130] sm:$0xff]   ;;  %v1581_v42 = vld [vmem:[%s2342_s3 + $0x178] sm:$0xff]  }
  0x3a   :  { %552 = vmatpush1.bf16.msra.mxu0 %v1258_v52  ;;  %595 = vmatpush1.bf16.msra.mxu1 %v1260_v53 }
  0x3b   :  { %553 = vmatprep.subr.bf16.mxu0 %v1267_v54  ;;  %596 = vmatprep.subr.bf16.mxu1 %v1269_v55 }
  0x3e   :  { %554 = vmatpush1.bf16.msra.mxu0 %v1266_v60  ;;  %597 = vmatpush1.bf16.msra.mxu1 %v1268_v61 }
  0x3f   :  { %555 = vmatprep.subr.bf16.mxu0 %v1275_v62  ;;  %598 = vmatprep.subr.bf16.mxu1 %v1277_v63 }
  0x42   :  { %556 = vmatpush1.bf16.msra.mxu0 %v1274_v0  ;;  %599 = vmatpush1.bf16.msra.mxu1 %v1276_v1 }
  0x43   :  { %1751 = vmatprep.subr.bf16.mxu0 %v1542_v2  ;;  %1783 = vmatprep.subr.bf16.mxu1 %v1558_v4 }
  0x45   :  { %574 = vmatmul.mubr.bf16.vlgmr.msra.gmra.mrb[4].mxu0 %v2030_v10  ;;  %617 = vmatmul.mubr.bf16.vlgmr.msra.gmra.mrb[4].mxu1 %v2030_v10  ;;  %v1560_v10 = vld [vmem:[%s2342_s3 + $0xd0] sm:$0xff]  }
  0x46   :  { %1753 = vmatpush3.bf16.msra.mxu0 %v1280_v5  ;;  %1785 = vmatpush3.bf16.msra.mxu1 %v1550_v6  ;;  %v1566_v5 = vld [vmem:[%s2342_s3 + $0x100] sm:$0xff]  }
  0x47   :  { %1755 = vmatprep.subr.bf16.mxu0 %v1543_v7  ;;  %1787 = vmatprep.subr.bf16.mxu1 %v1559_v8  ;;  %v1582_v7 = vld [vmem:[%s2342_s3 + $0x180] sm:$0xff]   ;;  %v1575_v8 = vld [vmem:[%s2342_s3 + $0x148] sm:$0xff]  }
  0x4a   :  { %1757 = vmatpush3.bf16.msra.mxu0 %v1535_v9  ;;  %1789 = vmatpush3.bf16.msra.mxu1 %v1551_v11  ;;  %v1591_v9 = vld [vmem:[%s2342_s3 + $0x1c8] sm:$0xff]  }
  0x4b   :  { %1759 = vmatprep.subr.bf16.mxu0 %v1544_v12  ;;  %1791 = vmatprep.subr.bf16.mxu1 %v1560_v10  ;;  %v1567_v10 = vld [vmem:[%s2342_s3 + $0x108] sm:$0xff]  }
  0x4e   :  { %1761 = vmatpush3.bf16.msra.mxu0 %v1536_v13  ;;  %1793 = vmatpush3.bf16.msra.mxu1 %v1552_v14  ;;  %v1583_v13 = vld [vmem:[%s2342_s3 + $0x188] sm:$0xff]   ;;  %v1576_v14 = vld [vmem:[%s2342_s3 + $0x150] sm:$0xff]  }
  0x4f   :  { %1763 = vmatprep.subr.bf16.mxu0 %v1545_v15  ;;  %1795 = vmatprep.subr.bf16.mxu1 %v1561_v16  ;;  %v1592_v15 = vld [vmem:[%s2342_s3 + $0x1d0] sm:$0xff]  }
  0x50   :  { %v1568_v16 = vld [vmem:[%s2342_s3 + $0x110] sm:$0xff]  }
  0x52   :  { %1765 = vmatpush3.bf16.msra.mxu0 %v1537_v17  ;;  %1797 = vmatpush3.bf16.msra.mxu1 %v1553_v18  ;;  %v1584_v17 = vld [vmem:[%s2342_s3 + $0x190] sm:$0xff]   ;;  %v1577_v18 = vld [vmem:[%s2342_s3 + $0x158] sm:$0xff]  }
  0x53   :  { %1767 = vmatprep.subr.bf16.mxu0 %v1546_v19  ;;  %1799 = vmatprep.subr.bf16.mxu1 %v1562_v20  ;;  %v1593_v19 = vld [vmem:[%s2342_s3 + $0x1d8] sm:$0xff]  }
  0x54   :  { %v1569_v20 = vld [vmem:[%s2342_s3 + $0x118] sm:$0xff]  }
  0x56   :  { %1769 = vmatpush3.bf16.msra.mxu0 %v1538_v21  ;;  %1801 = vmatpush3.bf16.msra.mxu1 %v1554_v22  ;;  %v1585_v21 = vld [vmem:[%s2342_s3 + $0x198] sm:$0xff]   ;;  %v1578_v22 = vld [vmem:[%s2342_s3 + $0x160] sm:$0xff]  }
  0x57   :  { %1771 = vmatprep.subr.bf16.mxu0 %v1547_v23  ;;  %1803 = vmatprep.subr.bf16.mxu1 %v1563_v24  ;;  %v1594_v23 = vld [vmem:[%s2342_s3 + $0x1e0] sm:$0xff]  }
  0x58   :  { %v1570_v24 = vld [vmem:[%s2342_s3 + $0x120] sm:$0xff]  }
  0x5a   :  { %1773 = vmatpush3.bf16.msra.mxu0 %v1539_v25  ;;  %1805 = vmatpush3.bf16.msra.mxu1 %v1555_v26  ;;  %v1586_v25 = vld [vmem:[%s2342_s3 + $0x1a0] sm:$0xff]   ;;  %v1579_v26 = vld [vmem:[%s2342_s3 + $0x168] sm:$0xff]  }
  0x5b   :  { %1775 = vmatprep.subr.bf16.mxu0 %v1548_v27  ;;  %1807 = vmatprep.subr.bf16.mxu1 %v1564_v28  ;;  %v1595_v27 = vld [vmem:[%s2342_s3 + $0x1e8] sm:$0xff]  }
  0x5c   :  { %v1571_v28 = vld [vmem:[%s2342_s3 + $0x128] sm:$0xff]  }
  0x5e   :  { %1777 = vmatpush3.bf16.msra.mxu0 %v1540_v29  ;;  %1809 = vmatpush3.bf16.msra.mxu1 %v1556_v30  ;;  %v107_v29 = vsub.s32 4, %v2218_v37  ;;  %v115_v30 = vsub.s32 6, %v2218_v37 }
  0x5f   :  { %1779 = vmatprep.subr.bf16.mxu0 %v1549_v31  ;;  %1811 = vmatprep.subr.bf16.mxu1 %v1565_v32  ;;  %v111_v31 = vsub.s32 5, %v2218_v37  ;;  %v1587_v32 = vld [vmem:[%s2342_s3 + $0x1a8] sm:$0xff]  }
  0x60   :  { %v116_v36 = vrot.slane %v2224_v39, %v115_v30 }
  0x61   :  { %v112_v40 = vrot.slane %v2224_v39, %v111_v31 }
  0x62   :  { %1781 = vmatpush3.bf16.msra.mxu0 %v1541_v33  ;;  %1813 = vmatpush3.bf16.msra.mxu1 %v1557_v34  ;;  %v1580_v33 = vld [vmem:[%s2342_s3 + $0x170] sm:$0xff]   ;;  %v119_v34 = vsub.s32 7, %v2218_v37 }
  0x63   :  { %1815 = vmatprep.subr.bf16.mxu0 %v1574_v3  ;;  %1847 = vmatprep.subr.bf16.mxu1 %v1590_v35  ;;  %v1596_v3 = vld [vmem:[%s2342_s3 + $0x1f0] sm:$0xff]   ;;  %v108_v35 = vrot.slane %v2224_v39, %v107_v29 }
  0x64   :  { %v1588_v37 = vld [vmem:[%s2342_s3 + $0x1b0] sm:$0xff]   ;;  %v120_v41 = vrot.slane %v2224_v39, %v119_v34  ;;  %v1573_v39 = vld [vmem:[%s2342_s3 + $0x138] sm:$0xff]  }
  0xf8   :  { %v489_v47 = vpop.f32.mrb[0].mxu0  ;;  %v532_v49 = vpop.f32.mrb[0].mxu1 }
  0xf9   :  { %v490_v48 = vadd.f32 %v489_v47, %v92_v43  ;;  %v491_v50 = vpop.f32.mrb[1].mxu0  ;;  %v533_v51 = vadd.f32 %v532_v49, %v100_v44  ;;  %v534_v53 = vpop.f32.mrb[1].mxu1 }
  0xfa   :  { %v492_v52 = vadd.f32 %v491_v50, %v96_v45  ;;  %v493_v54 = vpop.f32.mrb[2].mxu0  ;;  %v535_v56 = vadd.f32 %v534_v53, %v104_v46  ;;  %v536_v57 = vpop.f32.mrb[2].mxu1 }
  0xfb   :  { %v627_v55 = vmax.f32 %v490_v48, 0.0  ;;  %v495_v58 = vpop.f32.mrb[3].mxu0  ;;  %v629_v59 = vmax.f32 %v533_v51, 0.0  ;;  %v538_v62 = vpop.f32.mrb[3].mxu1  ;;  %v494_v0 = vadd.f32 %v493_v54, %v92_v43  ;;  %v537_v2 = vadd.f32 %v536_v57, %v100_v44  ;;  %v1597_v44 = vld [vmem:[%s2342_s3 + $0x1f8] sm:$0xff]  }
  0xfc   :  { %v628_v60 = vmax.f32 %v492_v52, 0.0  ;;  %v496_v61 = vadd.f32 %v495_v58, %v96_v45  ;;  %v630_v63 = vmax.f32 %v535_v56, 0.0  ;;  %v539_v1 = vadd.f32 %v538_v62, %v104_v46 }
  0xfd   :  { %v635_v11 = vmax.f32 %v494_v0, 0.0  ;;  %v637_v12 = vmax.f32 %v537_v2, 0.0 }
  0xfe   :  { %v636_v4 = vmax.f32 %v496_v61, 0.0  ;;  %970 = vmatprep.mubr.f32.mxu0 %v628_v60  ;;  %v638_v6 = vmax.f32 %v539_v1, 0.0  ;;  %1045 = vmatprep.mubr.f32.mxu1 %v630_v63 }
  0xff   :  { %971 = vmatmul.mubr.f32.vlgmr.msra.gmra.mrb[8].mxu0 %v627_v55  ;;  %1046 = vmatmul.mubr.f32.vlgmr.msra.gmra.mrb[8].mxu1 %v629_v59  ;;  %v1589_v55 = vld [vmem:[%s2342_s3 + $0x1b8] sm:$0xff]  }
 0x100   :  { %975 = vmatprep.mubr.f32.mxu0 %v636_v4  ;;  %1050 = vmatprep.mubr.f32.mxu1 %v638_v6 }
 0x101   :  { %1817 = vmatpush3.bf16.msra.mxu0 %v1566_v5  ;;  %1849 = vmatpush3.bf16.msra.mxu1 %v1582_v7 }
 0x102   :  { %1819 = vmatprep.subr.bf16.mxu0 %v1575_v8  ;;  %1851 = vmatprep.subr.bf16.mxu1 %v1591_v9  ;;  %v1278_v8 = vld [vmem:[%s2344_s4] ss:$0 sm:$0xff] }
 0x103   :  { %976 = vmatmul.mubr.f32.gmra.mrb[10].mxu0 %v635_v11  ;;  %1051 = vmatmul.mubr.f32.gmra.mrb[10].mxu1 %v637_v12 }
 0x105   :  { %1821 = vmatpush3.bf16.msra.mxu0 %v1567_v10  ;;  %1853 = vmatpush3.bf16.msra.mxu1 %v1583_v13 }
 0x106   :  { %1823 = vmatprep.subr.bf16.mxu0 %v1576_v14  ;;  %1855 = vmatprep.subr.bf16.mxu1 %v1592_v15 }
 0x109   :  { %1825 = vmatpush3.bf16.msra.mxu0 %v1568_v16  ;;  %1857 = vmatpush3.bf16.msra.mxu1 %v1584_v17 }
 0x10a   :  { %1827 = vmatprep.subr.bf16.mxu0 %v1577_v18  ;;  %1859 = vmatprep.subr.bf16.mxu1 %v1593_v19 }
 0x10d   :  { %1829 = vmatpush3.bf16.msra.mxu0 %v1569_v20  ;;  %1861 = vmatpush3.bf16.msra.mxu1 %v1585_v21 }
 0x10e   :  { %1831 = vmatprep.subr.bf16.mxu0 %v1578_v22  ;;  %1863 = vmatprep.subr.bf16.mxu1 %v1594_v23 }
 0x111   :  { %1833 = vmatpush3.bf16.msra.mxu0 %v1570_v24  ;;  %1865 = vmatpush3.bf16.msra.mxu1 %v1586_v25 }
 0x112   :  { %1835 = vmatprep.subr.bf16.mxu0 %v1579_v26  ;;  %1867 = vmatprep.subr.bf16.mxu1 %v1595_v27 }
 0x115   :  { %1837 = vmatpush3.bf16.msra.mxu0 %v1571_v28  ;;  %1869 = vmatpush3.bf16.msra.mxu1 %v1587_v32 }
 0x116   :  { %1839 = vmatprep.subr.bf16.mxu0 %v1580_v33  ;;  %1871 = vmatprep.subr.bf16.mxu1 %v1596_v3 }
 0x118   :  { %v575_v43 = vpop.f32.mrb[4].mxu0  ;;  %v618_v45 = vpop.f32.mrb[4].mxu1 }
 0x119   :  { %1841 = vmatpush3.bf16.msra.mxu0 %v1572_v38  ;;  %v577_v46 = vpop.f32.mrb[5].mxu0  ;;  %v576_v47 = vadd.f32 %v575_v43, %v108_v35  ;;  %v619_v48 = vadd.f32 %v618_v45, %v116_v36  ;;  %1873 = vmatpush3.bf16.msra.mxu1 %v1588_v37  ;;  %v620_v50 = vpop.f32.mrb[5].mxu1 }
 0x11a   :  { %v578_v49 = vadd.f32 %v577_v46, %v112_v40  ;;  %v579_v51 = vpop.f32.mrb[6].mxu0  ;;  %1843 = vmatprep.subr.bf16.mxu0 %v1581_v42  ;;  %v621_v52 = vadd.f32 %v620_v50, %v120_v41  ;;  %v622_v53 = vpop.f32.mrb[6].mxu1  ;;  %1875 = vmatprep.subr.bf16.mxu1 %v1597_v44 }
 0x11b   :  { %v581_v54 = vpop.f32.mrb[7].mxu0  ;;  %v624_v58 = vpop.f32.mrb[7].mxu1  ;;  %v633_v59 = vmax.f32 %v619_v48, 0.0  ;;  %v631_v62 = vmax.f32 %v576_v47, 0.0  ;;  %v580_v63 = vadd.f32 %v579_v51, %v108_v35  ;;  %v623_v1 = vadd.f32 %v622_v53, %v116_v36 }
 0x11c   :  { %v632_v56 = vmax.f32 %v578_v49, 0.0  ;;  %v582_v57 = vadd.f32 %v581_v54, %v112_v40  ;;  %v634_v60 = vmax.f32 %v621_v52, 0.0  ;;  %v625_v61 = vadd.f32 %v624_v58, %v120_v41 }
 0x11d   :  { %1845 = vmatpush3.bf16.msra.mxu0 %v1573_v39  ;;  %1877 = vmatpush3.bf16.msra.mxu1 %v1589_v55  ;;  %v639_v4 = vmax.f32 %v580_v63, 0.0  ;;  %v641_v5 = vmax.f32 %v623_v1, 0.0 }
 0x11e   :  { %v640_v0 = vmax.f32 %v582_v57, 0.0  ;;  %1120 = vmatprep.mubr.f32.mxu0 %v632_v56  ;;  %v642_v2 = vmax.f32 %v625_v61, 0.0  ;;  %1195 = vmatprep.mubr.f32.mxu1 %v634_v60 }
 0x120   :  { %1121 = vmatmul.mubr.f32.vlgmr.msra.gmra.mrb[12].mxu0 %v631_v62  ;;  %1196 = vmatmul.mubr.f32.vlgmr.msra.gmra.mrb[12].mxu1 %v633_v59 }
 0x121   :  { %1125 = vmatprep.mubr.f32.mxu0 %v640_v0  ;;  %1200 = vmatprep.mubr.f32.mxu1 %v642_v2 }
 0x124   :  { %1126 = vmatmul.mubr.f32.gmra.mrb[14].mxu0 %v639_v4  ;;  %1201 = vmatmul.mubr.f32.gmra.mrb[14].mxu1 %v641_v5 }
 0x1d2   :  { %v1630_v6 = vpop.f32.mrb[8].mxu0  ;;  %v1668_v7 = vpop.f32.mrb[8].mxu1 }
 0x1d3   :  { %v1631_v9 = vpop.f32.mrb[9].mxu0  ;;  %v1669_v12 = vpop.f32.mrb[9].mxu1 }
 0x1d4   :  { %v1632_v11 = vadd.f32 %v1631_v9, %v1630_v6  ;;  %v1670_v10 = vadd.f32 %v1669_v12, %v1668_v7 }
 0x1d6   :  { %v973_v13 = vadd.f32 %v1632_v11, %v1278_v8  ;;  %v1633_v14 = vpop.f32.mrb[10].mxu0  ;;  %v1671_v15 = vpop.f32.mrb[10].mxu1 }
 0x1d7   :  { %v1634_v16 = vpop.f32.mrb[11].mxu0  ;;  %v1672_v19 = vpop.f32.mrb[11].mxu1 }
 0x1d8   :  { %v1048_v17 = vadd.f32 %v1670_v10, %v973_v13  ;;  %v1635_v18 = vadd.f32 %v1634_v16, %v1633_v14  ;;  %v1673_v20 = vadd.f32 %v1672_v19, %v1671_v15 }
 0x1da   :  { %v978_v21 = vadd.f32 %v1635_v18, %v1278_v8 }
 0x1dc   :  { %v1053_v22 = vadd.f32 %v1673_v20, %v978_v21 }
 0x1f3   :  { %v1706_v23 = vpop.f32.mrb[12].mxu0  ;;  %v1744_v24 = vpop.f32.mrb[12].mxu1 }
 0x1f4   :  { %v1707_v25 = vpop.f32.mrb[13].mxu0  ;;  %v1745_v27 = vpop.f32.mrb[13].mxu1 }
 0x1f5   :  { %v1708_v26 = vadd.f32 %v1707_v25, %v1706_v23  ;;  %v1746_v28 = vadd.f32 %v1745_v27, %v1744_v24 }
 0x1f7   :  { %v1123_v29 = vadd.f32 %v1708_v26, %v1048_v17  ;;  %v1709_v30 = vpop.f32.mrb[14].mxu0  ;;  %v1747_v31 = vpop.f32.mrb[14].mxu1 }
 0x1f8   :  { %v1710_v32 = vpop.f32.mrb[15].mxu0  ;;  %v1748_v3 = vpop.f32.mrb[15].mxu1 }
 0x1f9   :  { %v1198_v33 = vadd.f32 %v1746_v28, %v1123_v29  ;;  %v1711_v34 = vadd.f32 %v1710_v32, %v1709_v30  ;;  %v1749_v35 = vadd.f32 %v1748_v3, %v1747_v31 }
 0x1fb   :  { %1207 = vst.msk [vmem:[%s2345_s5] sm:$0xff] %vm1206_vm0, %v1198_v33  ;;  %v1128_v36 = vadd.f32 %v1711_v34, %v1053_v22 }
 0x1fd   :  { %v1203_v38 = vadd.f32 %v1749_v35, %v1128_v36 }
 0x1ff   :  { %1208 = vst.msk [vmem:[%s2345_s5 + $0x8] sm:$0xff] %vm1206_vm0, %v1203_v38 }

</bundles_post_ra>
